<compile_context>
chip_gen: v5e
topology: v5e:2x2
jax: 0.10.0
libtpu: 0.0.40
codegen_flags: <defaults>
</compile_context>

<pallas_src>
import functools

import jax
import jax.numpy as jnp
from jax.experimental import pallas as pl
from jax.experimental.pallas import tpu as pltpu


def _mdn_kernel(x_ref,
                w1_ref, b1_ref,
                w2_ref, b2_ref,
                w3_ref, b3_ref,
                whead_ref, bhead_ref,
                pi_ref, mu_ref, sigma_ref,
                *, k, input_dim):
    """One batch tile, batch-in-lanes: every value is [features, block_b]."""
    x = x_ref[...]                                        # [input_dim, bb] f32

    # fc1 + relu.  For input_dim == 1 a K=1 MXU matmul wastes a systolic pass;
    # the outer product w1[:, :1] * x[0:1, :] is a pure VPU broadcast multiply.
    if input_dim == 1:
        h = w1_ref[...] * x + b1_ref[...]                 # [64,1]*[1,bb] -> [64,bb]
    else:
        h = jnp.dot(w1_ref[...], x,
                    preferred_element_type=jnp.float32) + b1_ref[...]
    h = jnp.maximum(h, 0.0)

    # fc2 + relu: [32,64] @ [64,bb] -> [32,bb]  (MXU streaming dim = batch)
    h = jnp.dot(w2_ref[...], h, preferred_element_type=jnp.float32) + b2_ref[...]
    h = jnp.maximum(h, 0.0)

    # fc3 + tanh: [16,32] @ [32,bb] -> [16,bb]
    h = jnp.dot(w3_ref[...], h, preferred_element_type=jnp.float32) + b3_ref[...]
    h = jnp.tanh(h)

    # Fused heads: one [3k,16] @ [16,bb] matmul -> pi | mu | sigma stacked
    # along the sublane axis.
    heads = jnp.dot(whead_ref[...], h,
                    preferred_element_type=jnp.float32) + bhead_ref[...]
    pi_logits = heads[0:k, :]                             # [k, bb]
    mu = heads[k:2 * k, :]
    sigma_logits = heads[2 * k:3 * k, :]

    # Softmax over the k mixture components (sublane axis); the lane axis
    # (batch) stays full width.  Exact reciprocal so every column sums to 1.
    m = jnp.max(pi_logits, axis=0, keepdims=True)         # [1, bb]
    e = jnp.exp(pi_logits - m)
    inv = pl.reciprocal(jnp.sum(e, axis=0, keepdims=True), approx=False)

    pi_ref[...] = (e * inv).astype(pi_ref.dtype)
    mu_ref[...] = mu.astype(mu_ref.dtype)
    sigma_ref[...] = jnp.exp(sigma_logits).astype(sigma_ref.dtype)


def _cdiv(a, b):
    return -(-a // b)


def _round_up(a, b):
    return _cdiv(a, b) * b


def _choose_tiling(B, max_block=16384):
    """Batch tiling: block_b is a multiple of 128 (lane axis), <= max_block rows.
    When more than one grid step is needed, keep the step count even so v7x's
    two TensorCores get equal work; single TC chips (v5e/v6e) get 1 big step."""
    steps = _cdiv(B, max_block)
    if steps > 1 and steps % 2 == 1:
        steps += 1
    block_b = _round_up(_cdiv(B, steps), 128)
    return block_b, steps * block_b


@jax.jit
def simple_mdn_forward(x, params):
    """SimpleMdnNN forward pass inside one Pallas kernel.

    x: [B, input_dim] float32
    params: PyTorch-layout weights (W: [out, in]) and biases (b: [out, 1])
    returns: (pi, mu, sigma), each [B, k_gaussians]
    """
    B, input_dim = x.shape
    k = params["wpi"].shape[0]

    block_b, Bp = _choose_tiling(B)
    grid = (Bp // block_b,)

    # Batch-in-lanes input: [input_dim, Bp], zero-padded to the tile multiple.
    # For input_dim == 1 the transpose is a free reshape.
    x_t = jnp.pad(x.astype(jnp.float32).T, ((0, 0), (0, Bp - B)))

    # Fuse the three head weights/biases once in the wrapper ([3k,16] / [3k,1]).
    whead = jnp.concatenate([params["wpi"], params["wmu"], params["wsg"]], axis=0)
    bhead = jnp.concatenate([params["bpi"], params["bmu"], params["bsg"]], axis=0)

    weight_args = [params["w1"], params["b1"],
                   params["w2"], params["b2"],
                   params["w3"], params["b3"],
                   whead, bhead]
    # Constant index_map: the pipeline fetches each weight block once and
    # re-uses it across every grid step (no per-step re-DMA).
    weight_specs = [pl.BlockSpec(a.shape, lambda i: (0, 0)) for a in weight_args]

    x_spec = pl.BlockSpec((input_dim, block_b), lambda i: (0, i))
    out_specs = [pl.BlockSpec((k, block_b), lambda i: (0, i)) for _ in range(3)]
    out_shapes = tuple(jax.ShapeDtypeStruct((k, Bp), jnp.float32) for _ in range(3))

    n_weight_elems = sum(int(a.size) for a in weight_args)
    cost = pl.CostEstimate(
        flops=2 * Bp * (input_dim * 64 + 64 * 32 + 32 * 16 + 16 * 3 * k),
        transcendentals=Bp * (16 + 2 * k + 1),
        bytes_accessed=4 * (Bp * (input_dim + 3 * k) + n_weight_elems),
    )

    kernel = functools.partial(_mdn_kernel, k=k, input_dim=input_dim)

    pi_t, mu_t, sigma_t = pl.pallas_call(
        kernel,
        out_shape=out_shapes,
        grid_spec=pltpu.PrefetchScalarGridSpec(
            num_scalar_prefetch=0,
            grid=grid,
            in_specs=[x_spec] + weight_specs,
            out_specs=out_specs,
        ),
        compiler_params=pltpu.CompilerParams(
            dimension_semantics=("parallel",),
            vmem_limit_bytes=48 * 1024 * 1024,
        ),
        cost_estimate=cost,
    )(x_t, *weight_args)

    # Strip the batch padding and return in the PyTorch [B, k] layout.
    return pi_t[:, :B].T, mu_t[:, :B].T, sigma_t[:, :B].T


def init_params(key, input_dim=1, k_gaussians=3):
    """Deterministic synthetic init, PyTorch nn.Linear layout (W: [out,in])."""
    dims = [
        ("w1", "b1", input_dim, 64),
        ("w2", "b2", 64, 32),
        ("w3", "b3", 32, 16),
        ("wpi", "bpi", 16, k_gaussians),
        ("wmu", "bmu", 16, k_gaussians),
        ("wsg", "bsg", 16, k_gaussians),
    ]
    params = {}
    for wname, bname, fan_in, fan_out in dims:
        key, kw, kb = jax.random.split(key, 3)
        bound = 1.0 / jnp.sqrt(jnp.float32(fan_in))
        params[wname] = jax.random.uniform(
            kw, (fan_out, fan_in), jnp.float32, -bound, bound)
        params[bname] = jax.random.uniform(
            kb, (fan_out, 1), jnp.float32, -bound, bound)
    return params


def reference_forward(x, params):
    """Pure-JAX reference (highest matmul precision) for sanity checking."""
    hp = jax.lax.Precision.HIGHEST
    h = jnp.maximum(jnp.dot(x, params["w1"].T, precision=hp) + params["b1"].T, 0.0)
    h = jnp.maximum(jnp.dot(h, params["w2"].T, precision=hp) + params["b2"].T, 0.0)
    h = jnp.tanh(jnp.dot(h, params["w3"].T, precision=hp) + params["b3"].T)
    pi_logits = jnp.dot(h, params["wpi"].T, precision=hp) + params["bpi"].T
    mu = jnp.dot(h, params["wmu"].T, precision=hp) + params["bmu"].T
    sigma = jnp.exp(jnp.dot(h, params["wsg"].T, precision=hp) + params["bsg"].T)
    pi = jax.nn.softmax(pi_logits, axis=1)
    return pi, mu, sigma


if __name__ == "__main__":
    key = jax.random.PRNGKey(0)
    key, kx, kp = jax.random.split(key, 3)

    B, input_dim, k_gaussians = 8, 1, 3
    x = jax.random.normal(kx, (B, input_dim), jnp.float32)
    params = init_params(kp, input_dim=input_dim, k_gaussians=k_gaussians)

    pi, mu, sigma = simple_mdn_forward(x, params)
    jax.block_until_ready((pi, mu, sigma))

    pi_ref, mu_ref, sigma_ref = reference_forward(x, params)
    assert pi.shape == (B, k_gaussians)
    assert mu.shape == (B, k_gaussians)
    assert sigma.shape == (B, k_gaussians)
    assert jnp.allclose(pi, pi_ref, atol=1e-3, rtol=1e-3)
    assert jnp.allclose(mu, mu_ref, atol=1e-3, rtol=1e-3)
    assert jnp.allclose(sigma, sigma_ref, atol=1e-3, rtol=1e-3)
    # Exact reciprocal in the kernel -> mixture weights sum to 1 within rounding.
    assert jnp.allclose(jnp.sum(pi, axis=1), 1.0, atol=1e-3)
    assert bool(jnp.all(sigma > 0.0))

    print("KERNEL_OK")
</pallas_src>

<mosaic_0001>
module attributes {stable_mosaic.version = 11 : i64} {
  func.func @_mdn_kernel(%arg0: i32, %arg1: memref<1x128xf32, #tpu.memory_space<vmem>>, %arg2: memref<64x1xf32, #tpu.memory_space<vmem>>, %arg3: memref<64x1xf32, #tpu.memory_space<vmem>>, %arg4: memref<32x64xf32, #tpu.memory_space<vmem>>, %arg5: memref<32x1xf32, #tpu.memory_space<vmem>>, %arg6: memref<16x32xf32, #tpu.memory_space<vmem>>, %arg7: memref<16x1xf32, #tpu.memory_space<vmem>>, %arg8: memref<9x16xf32, #tpu.memory_space<vmem>>, %arg9: memref<9x1xf32, #tpu.memory_space<vmem>>, %arg10: memref<3x128xf32, #tpu.memory_space<vmem>>, %arg11: memref<3x128xf32, #tpu.memory_space<vmem>>, %arg12: memref<3x128xf32, #tpu.memory_space<vmem>>) attributes {dimension_semantics = [#tpu.dimension_semantics<parallel>], iteration_bounds = array<i64: 1>, scalar_prefetch = 0 : i64, scratch_operands = 0 : i64, tpu.core_type = #tpu.core_type<tc>, window_params = [{transform_indices = @transform_0, window_bounds = array<i64: 1, 128>}, {pipeline_mode = #tpu.pipeline_mode<synchronous>, transform_indices = @transform_1, window_bounds = array<i64: 64, 1>}, {pipeline_mode = #tpu.pipeline_mode<synchronous>, transform_indices = @transform_2, window_bounds = array<i64: 64, 1>}, {pipeline_mode = #tpu.pipeline_mode<synchronous>, transform_indices = @transform_3, window_bounds = array<i64: 32, 64>}, {pipeline_mode = #tpu.pipeline_mode<synchronous>, transform_indices = @transform_4, window_bounds = array<i64: 32, 1>}, {pipeline_mode = #tpu.pipeline_mode<synchronous>, transform_indices = @transform_5, window_bounds = array<i64: 16, 32>}, {pipeline_mode = #tpu.pipeline_mode<synchronous>, transform_indices = @transform_6, window_bounds = array<i64: 16, 1>}, {pipeline_mode = #tpu.pipeline_mode<synchronous>, transform_indices = @transform_7, window_bounds = array<i64: 9, 16>}, {pipeline_mode = #tpu.pipeline_mode<synchronous>, transform_indices = @transform_8, window_bounds = array<i64: 9, 1>}, {transform_indices = @transform_9, window_bounds = array<i64: 3, 128>}, {transform_indices = @transform_10, window_bounds = array<i64: 3, 128>}, {transform_indices = @transform_11, window_bounds = array<i64: 3, 128>}]} {
    %c0 = arith.constant 0 : index
    %c0_0 = arith.constant 0 : index
    %0 = vector.load %arg1[%c0, %c0_0] : memref<1x128xf32, #tpu.memory_space<vmem>>, vector<1x128xf32>
    %c0_1 = arith.constant 0 : index
    %c0_2 = arith.constant 0 : index
    %1 = vector.load %arg2[%c0_1, %c0_2] : memref<64x1xf32, #tpu.memory_space<vmem>>, vector<64x1xf32>
    %2 = vector.broadcast %1 : vector<64x1xf32> to vector<64x128xf32>
    %3 = vector.broadcast %0 : vector<1x128xf32> to vector<64x128xf32>
    %4 = arith.mulf %2, %3 : vector<64x128xf32>
    %c0_3 = arith.constant 0 : index
    %c0_4 = arith.constant 0 : index
    %5 = vector.load %arg3[%c0_3, %c0_4] : memref<64x1xf32, #tpu.memory_space<vmem>>, vector<64x1xf32>
    %6 = vector.broadcast %5 : vector<64x1xf32> to vector<64x128xf32>
    %7 = arith.addf %4, %6 : vector<64x128xf32>
    %cst = arith.constant 0.000000e+00 : f32
    %8 = vector.broadcast %cst : f32 to vector<64x128xf32>
    %9 = arith.maximumf %7, %8 : vector<64x128xf32>
    %c0_5 = arith.constant 0 : index
    %c0_6 = arith.constant 0 : index
    %10 = vector.load %arg4[%c0_5, %c0_6] : memref<32x64xf32, #tpu.memory_space<vmem>>, vector<32x64xf32>
    %cst_7 = arith.constant dense<0.000000e+00> : vector<32x128xf32>
    %11 = tpu.matmul %10, %9, %cst_7 {dimension_numbers = #tpu.dot_dimension_numbers<[1], [0], [0], [1], [0, 0, 1, 1], [], []>} : vector<32x64xf32>, vector<64x128xf32>, vector<32x128xf32> -> vector<32x128xf32>
    %c0_8 = arith.constant 0 : index
    %c0_9 = arith.constant 0 : index
    %12 = vector.load %arg5[%c0_8, %c0_9] : memref<32x1xf32, #tpu.memory_space<vmem>>, vector<32x1xf32>
    %13 = vector.broadcast %12 : vector<32x1xf32> to vector<32x128xf32>
    %14 = arith.addf %11, %13 : vector<32x128xf32>
    %cst_10 = arith.constant 0.000000e+00 : f32
    %15 = vector.broadcast %cst_10 : f32 to vector<32x128xf32>
    %16 = arith.maximumf %14, %15 : vector<32x128xf32>
    %c0_11 = arith.constant 0 : index
    %c0_12 = arith.constant 0 : index
    %17 = vector.load %arg6[%c0_11, %c0_12] : memref<16x32xf32, #tpu.memory_space<vmem>>, vector<16x32xf32>
    %cst_13 = arith.constant dense<0.000000e+00> : vector<16x128xf32>
    %18 = tpu.matmul %17, %16, %cst_13 {dimension_numbers = #tpu.dot_dimension_numbers<[1], [0], [0], [1], [0, 0, 1, 1], [], []>} : vector<16x32xf32>, vector<32x128xf32>, vector<16x128xf32> -> vector<16x128xf32>
    %c0_14 = arith.constant 0 : index
    %c0_15 = arith.constant 0 : index
    %19 = vector.load %arg7[%c0_14, %c0_15] : memref<16x1xf32, #tpu.memory_space<vmem>>, vector<16x1xf32>
    %20 = vector.broadcast %19 : vector<16x1xf32> to vector<16x128xf32>
    %21 = arith.addf %18, %20 : vector<16x128xf32>
    %22 = math.tanh %21 : vector<16x128xf32>
    %c0_16 = arith.constant 0 : index
    %c0_17 = arith.constant 0 : index
    %23 = vector.load %arg8[%c0_16, %c0_17] : memref<9x16xf32, #tpu.memory_space<vmem>>, vector<9x16xf32>
    %cst_18 = arith.constant dense<0.000000e+00> : vector<9x128xf32>
    %24 = tpu.matmul %23, %22, %cst_18 {dimension_numbers = #tpu.dot_dimension_numbers<[1], [0], [0], [1], [0, 0, 1, 1], [], []>} : vector<9x16xf32>, vector<16x128xf32>, vector<9x128xf32> -> vector<9x128xf32>
    %c0_19 = arith.constant 0 : index
    %c0_20 = arith.constant 0 : index
    %25 = vector.load %arg9[%c0_19, %c0_20] : memref<9x1xf32, #tpu.memory_space<vmem>>, vector<9x1xf32>
    %26 = vector.broadcast %25 : vector<9x1xf32> to vector<9x128xf32>
    %27 = arith.addf %24, %26 : vector<9x128xf32>
    %28 = vector.extract_strided_slice %27 {offsets = [0, 0], sizes = [3, 128], strides = [1, 1]} : vector<9x128xf32> to vector<3x128xf32>
    %29 = vector.extract_strided_slice %27 {offsets = [3, 0], sizes = [3, 128], strides = [1, 1]} : vector<9x128xf32> to vector<3x128xf32>
    %30 = vector.extract_strided_slice %27 {offsets = [6, 0], sizes = [3, 128], strides = [1, 1]} : vector<9x128xf32> to vector<3x128xf32>
    %cst_21 = arith.constant dense<0xFF800000> : vector<128xf32>
    %31 = vector.multi_reduction <maximumf>, %28, %cst_21 [0] : vector<3x128xf32> to vector<128xf32>
    %32 = vector.shape_cast %31 : vector<128xf32> to vector<1x128xf32>
    %33 = vector.broadcast %32 : vector<1x128xf32> to vector<3x128xf32>
    %34 = arith.subf %28, %33 : vector<3x128xf32>
    %35 = math.exp %34 : vector<3x128xf32>
    %cst_22 = arith.constant dense<0.000000e+00> : vector<128xf32>
    %36 = vector.multi_reduction <add>, %35, %cst_22 [0] : vector<3x128xf32> to vector<128xf32>
    %37 = vector.shape_cast %36 : vector<128xf32> to vector<1x128xf32>
    %38 = tpu.reciprocal %37 : vector<1x128xf32> -> vector<1x128xf32>
    %39 = vector.broadcast %38 : vector<1x128xf32> to vector<3x128xf32>
    %40 = arith.mulf %35, %39 : vector<3x128xf32>
    %c0_23 = arith.constant 0 : index
    %c0_24 = arith.constant 0 : index
    %41 = vector.load %arg10[%c0_23, %c0_24] : memref<3x128xf32, #tpu.memory_space<vmem>>, vector<3x128xf32>
    tpu.vector_store %arg10[%c0_23, %c0_24], %40 {strides = array<i32>} : memref<3x128xf32, #tpu.memory_space<vmem>>, vector<3x128xf32>,
    %c0_25 = arith.constant 0 : index
    %c0_26 = arith.constant 0 : index
    %42 = vector.load %arg11[%c0_25, %c0_26] : memref<3x128xf32, #tpu.memory_space<vmem>>, vector<3x128xf32>
    tpu.vector_store %arg11[%c0_25, %c0_26], %29 {strides = array<i32>} : memref<3x128xf32, #tpu.memory_space<vmem>>, vector<3x128xf32>,
    %43 = math.exp %30 : vector<3x128xf32>
    %c0_27 = arith.constant 0 : index
    %c0_28 = arith.constant 0 : index
    %44 = vector.load %arg12[%c0_27, %c0_28] : memref<3x128xf32, #tpu.memory_space<vmem>>, vector<3x128xf32>
    tpu.vector_store %arg12[%c0_27, %c0_28], %43 {strides = array<i32>} : memref<3x128xf32, #tpu.memory_space<vmem>>, vector<3x128xf32>,
    return
  }
  func.func @transform_0(%arg0: i32) -> (i32, i32) {
    %c0_i32 = arith.constant 0 : i32
    %c0_i32_0 = arith.constant 0 : i32
    return %c0_i32, %arg0 : i32, i32
  }
  func.func @transform_1(%arg0: i32) -> (i32, i32) {
    %c0_i32 = arith.constant 0 : i32
    %c0_i32_0 = arith.constant 0 : i32
    %c0_i32_1 = arith.constant 0 : i32
    return %c0_i32, %c0_i32_0 : i32, i32
  }
  func.func @transform_2(%arg0: i32) -> (i32, i32) {
    %c0_i32 = arith.constant 0 : i32
    %c0_i32_0 = arith.constant 0 : i32
    %c0_i32_1 = arith.constant 0 : i32
    return %c0_i32, %c0_i32_0 : i32, i32
  }
  func.func @transform_3(%arg0: i32) -> (i32, i32) {
    %c0_i32 = arith.constant 0 : i32
    %c0_i32_0 = arith.constant 0 : i32
    %c0_i32_1 = arith.constant 0 : i32
    return %c0_i32, %c0_i32_0 : i32, i32
  }
  func.func @transform_4(%arg0: i32) -> (i32, i32) {
    %c0_i32 = arith.constant 0 : i32
    %c0_i32_0 = arith.constant 0 : i32
    %c0_i32_1 = arith.constant 0 : i32
    return %c0_i32, %c0_i32_0 : i32, i32
  }
  func.func @transform_5(%arg0: i32) -> (i32, i32) {
    %c0_i32 = arith.constant 0 : i32
    %c0_i32_0 = arith.constant 0 : i32
    %c0_i32_1 = arith.constant 0 : i32
    return %c0_i32, %c0_i32_0 : i32, i32
  }
  func.func @transform_6(%arg0: i32) -> (i32, i32) {
    %c0_i32 = arith.constant 0 : i32
    %c0_i32_0 = arith.constant 0 : i32
    %c0_i32_1 = arith.constant 0 : i32
    return %c0_i32, %c0_i32_0 : i32, i32
  }
  func.func @transform_7(%arg0: i32) -> (i32, i32) {
    %c0_i32 = arith.constant 0 : i32
    %c0_i32_0 = arith.constant 0 : i32
    %c0_i32_1 = arith.constant 0 : i32
    return %c0_i32, %c0_i32_0 : i32, i32
  }
  func.func @transform_8(%arg0: i32) -> (i32, i32) {
    %c0_i32 = arith.constant 0 : i32
    %c0_i32_0 = arith.constant 0 : i32
    %c0_i32_1 = arith.constant 0 : i32
    return %c0_i32, %c0_i32_0 : i32, i32
  }
  func.func @transform_9(%arg0: i32) -> (i32, i32) {
    %c0_i32 = arith.constant 0 : i32
    %c0_i32_0 = arith.constant 0 : i32
    return %c0_i32, %arg0 : i32, i32
  }
  func.func @transform_10(%arg0: i32) -> (i32, i32) {
    %c0_i32 = arith.constant 0 : i32
    %c0_i32_0 = arith.constant 0 : i32
    return %c0_i32, %arg0 : i32, i32
  }
  func.func @transform_11(%arg0: i32) -> (i32, i32) {
    %c0_i32 = arith.constant 0 : i32
    %c0_i32_0 = arith.constant 0 : i32
    return %c0_i32, %arg0 : i32, i32
  }
}

</mosaic_0001>

<bundles_post_ra>
// kernel: simple_mdn_forward.1
= control target key start
LH: loop header
LB: loop body
LE: loop exit
PB: predicated region body
PF: predicated region fallthrough
CT: control target
= control target key end

     0   :  { %v409_v0 = vmov 0   ;;  %vm187_vm0 = vcmask 523264   ;;  %vm247_vm1 = vcmask 261120   ;;  %vm293_vm2 = vcmask 130048   ;;  %s583_s2 = inlined_call_operand.vmem [shape: f32[64,1], index: 2, kind: input, shape index: {}]   ;;  %s584_s1 = inlined_call_operand.vmem [shape: f32[64,1], index: 1, kind: input, shape index: {}]   ;;  %s585_s0 = inlined_call_operand.vmem [shape: f32[1,128], index: 0, kind: input, shape index: {}]   ;;  %s586_s4 = inlined_call_operand.vmem [shape: f32[32,1], index: 4, kind: input, shape index: {}]   ;;  %s587_s6 = inlined_call_operand.vmem [shape: f32[16,1], index: 6, kind: input, shape index: {}]   ;;  %s588_s8 = inlined_call_operand.vmem [shape: f32[9,1], index: 8, kind: input, shape index: {}]   ;;  %s589_s3 = inlined_call_operand.vmem [shape: f32[32,64], index: 3, kind: input, shape index: {}]   ;;  %s590_s5 = inlined_call_operand.vmem [shape: f32[16,32], index: 5, kind: input, shape index: {}]   ;;  %s591_s7 = inlined_call_operand.vmem [shape: f32[9,16], index: 7, kind: input, shape index: {}]   ;;  %s592_s10 = inlined_call_operand.vmem [shape: f32[3,128], index: 10, kind: output, shape index: {1}]   ;;  %s593_s11 = inlined_call_operand.vmem [shape: f32[3,128], index: 11, kind: output, shape index: {2}]   ;;  %s594_s9 = inlined_call_operand.vmem [shape: f32[3,128], index: 9, kind: output, shape index: {0}]  }
   0x1   :  { %395 = vset.pattern.permute.xlu2 %v409_v0  ;;  %394 = vset.pattern.permute.xlu1 %v409_v0  ;;  %v102_v1 = vld [vmem:[%s583_s2 + $0x38] sm:$0xff]  ;;  %v101_v2 = vld [vmem:[%s583_s2 + $0x30] sm:$0xff]  ;;  %v41_v4 = vld [vmem:[%s584_s1 + $0x28] sm:$0xff]  ;;  %vm323_vm3 = vcmask 1042432  }
   0x2   :  { %v43_v3 = vld [vmem:[%s584_s1 + $0x38] sm:$0xff]  ;;  %393 = vset.pattern.permute.xlu0 %v409_v0  ;;  %140 = vperm.xlu1 %394, %v102_v1   ;;  %v42_v5 = vld [vmem:[%s584_s1 + $0x30] sm:$0xff]  ;;  %v40_v6 = vld [vmem:[%s584_s1 + $0x20] sm:$0xff] }
   0x3   :  { %135 = vperm.xlu2 %395, %v101_v2   ;;  %81 = vperm.xlu0 %393, %v43_v3   ;;  %v39_v7 = vld [vmem:[%s584_s1 + $0x18] sm:$0xff]  ;;  %v100_v8 = vld [vmem:[%s583_s2 + $0x28] sm:$0xff]  ;;  %v99_v9 = vld [vmem:[%s583_s2 + $0x20] sm:$0xff] }
   0x4   :  { %v98_v10 = vld [vmem:[%s583_s2 + $0x18] sm:$0xff]  ;;  %v38_v11 = vld [vmem:[%s584_s1 + $0x10] sm:$0xff]  ;;  %v37_v12 = vld [vmem:[%s584_s1 + $0x8] sm:$0xff] }
   0x5   :  { %v36_v13 = vld [vmem:[%s584_s1] sm:$0xff]  ;;  %v97_v14 = vld [vmem:[%s583_s2 + $0x10] sm:$0xff]  ;;  %v96_v15 = vld [vmem:[%s583_s2 + $0x8] sm:$0xff] }
   0x6   :  { %v166_v16 = vld [vmem:[%s586_s4 + $0x18] sm:$0xff]  ;;  %v95_v17 = vld [vmem:[%s583_s2] sm:$0xff]  ;;  %v165_v18 = vld [vmem:[%s586_s4 + $0x10] sm:$0xff] }
   0x7   :  { %v163_v19 = vld [vmem:[%s586_s4] sm:$0xff]  ;;  %v164_v20 = vld [vmem:[%s586_s4 + $0x8] sm:$0xff]  ;;  %v161_v3 = vld [vmem:[%s589_s3 + $0x10] sm:$0xff] }
   0x8   :  { %v236_v21 = vld [vmem:[%s587_s6 + $0x8] sm:$0xff]  ;;  %v281_v22 = vld [vmem:[%s588_s8] sm:$0xff] }
   0x9   :  { %v235_v23 = vld [vmem:[%s587_s6] sm:$0xff]  ;;  %v282_v24 = vld [vmem:[%s588_s8 + $0x8] sm:$0x1] }
   0xa   :  { %71 = vperm.xlu1 %394, %v41_v4   ;;  %v396_v26 = vld [vmem:[%s585_s0] ss:$0 sm:$0xff]  ;;  %v160_v4 = vld [vmem:[%s589_s3 + $0x8] sm:$0xff] }
   0xb   :  { %76 = vperm.xlu0 %393, %v42_v5   ;;  %66 = vperm.xlu2 %395, %v40_v6   ;;  %v159_v2 = vld [vmem:[%s589_s3] sm:$0xff]  ;;  %v162_v5 = vld [vmem:[%s589_s3 + $0x18] sm:$0xff] }
  0x12   :  { %61 = vperm.xlu1 %394, %v39_v7  }
  0x13   :  { %130 = vperm.xlu0 %393, %v100_v8   ;;  %125 = vperm.xlu2 %395, %v99_v9  }
  0x1a   :  { %120 = vperm.xlu1 %394, %v98_v10  }
  0x1b   :  { %56 = vperm.xlu0 %393, %v38_v11   ;;  %51 = vperm.xlu2 %395, %v37_v12  }
  0x22   :  { %46 = vperm.xlu1 %394, %v36_v13  }
  0x23   :  { %115 = vperm.xlu0 %393, %v97_v14   ;;  %110 = vperm.xlu2 %395, %v96_v15  }
  0x2a   :  { %184 = vperm.xlu1 %394, %v166_v16  }
  0x2b   :  { %105 = vperm.xlu0 %393, %v95_v17   ;;  %179 = vperm.xlu2 %395, %v165_v18  }
  0x32   :  { %169 = vperm.xlu1 %394, %v163_v19  }
  0x33   :  { %174 = vperm.xlu0 %393, %v164_v20   ;;  %244 = vperm.xlu2 %395, %v236_v21  }
  0x3a   :  { %285 = vperm.xlu1 %394, %v281_v22   ;;  %v233_v22 = vld [vmem:[%s590_s5] sm:$0xff] }
  0x3b   :  { %239 = vperm.xlu0 %393, %v235_v23   ;;  %290 = vperm.xlu2 %395, %v282_v24   ;;  %v234_v23 = vld [vmem:[%s590_s5 + $0x8] sm:$0xff] }
  0x5d   :  { %v136_v25 = vpop.permute.xlu2 %135 }
  0x65   :  { %v67_v28 = vpop.permute.xlu2 %66 }
  0x66   :  { %v91_v38 = vmul.f32 %v396_v26, %v67_v28 }
  0x6d   :  { %v126_v36 = vpop.permute.xlu2 %125 }
  0x6e   :  { %v147_v43 = vadd.f32 %v126_v36, %v91_v38 }
  0x70   :  { %v155_v47 = vmax.f32 %v147_v43, 0.0 }
  0x74   :  { %v141_v27 = vpop.permute.xlu1 %140 }
  0x75   :  { %v82_v29 = vpop.permute.xlu0 %81  ;;  %v52_v46 = vpop.permute.xlu2 %51 }
  0x76   :  { %v94_v30 = vmul.f32 %v396_v26, %v82_v29  ;;  %v88_v53 = vmul.f32 %v396_v26, %v52_v46 }
  0x78   :  { %v150_v31 = vadd.f32 %v141_v27, %v94_v30 }
  0x7a   :  { %v158_v32 = vmax.f32 %v150_v31, 0.0  ;;  %v279_v31 = vld [vmem:[%s591_s7] sm:$0xff] }
  0x7c   :  { %208 = vmatpush.msra.mxu0 %v158_v32  ;;  %384 = vmatpush.msra.mxu3 %v158_v32  ;;  %v72_v33 = vpop.permute.xlu1 %71 }
  0x7d   :  { %v77_v34 = vpop.permute.xlu0 %76  ;;  %v92_v40 = vmul.f32 %v396_v26, %v72_v33  ;;  %v111_v54 = vpop.permute.xlu2 %110  ;;  %v280_v33 = vld [vmem:[%s591_s7 + $0x8] sm:$0x1] }
  0x7e   :  { %v93_v35 = vmul.f32 %v396_v26, %v77_v34  ;;  %v144_v57 = vadd.f32 %v111_v54, %v88_v53 }
  0x80   :  { %v149_v37 = vadd.f32 %v136_v25, %v93_v35  ;;  %v152_v61 = vmax.f32 %v144_v57, 0.0 }
  0x82   :  { %v157_v39 = vmax.f32 %v149_v37, 0.0 }
  0x84   :  { %209 = vmatpush.msra.mxu0 %v157_v39  ;;  %385 = vmatpush.msra.mxu3 %v157_v39  ;;  %v62_v41 = vpop.permute.xlu1 %61 }
  0x85   :  { %v131_v42 = vpop.permute.xlu0 %130  ;;  %v90_v48 = vmul.f32 %v396_v26, %v62_v41  ;;  %v180_v9 = vpop.permute.xlu2 %179 }
  0x86   :  { %v148_v44 = vadd.f32 %v131_v42, %v92_v40 }
  0x88   :  { %v156_v45 = vmax.f32 %v148_v44, 0.0 }
  0x8a   :  { %210 = vmatpush.msra.mxu0 %v156_v45  ;;  %386 = vmatpush.msra.mxu3 %v156_v45 }
  0x8c   :  { %211 = vmatpush.msra.mxu0 %v155_v47  ;;  %387 = vmatpush.msra.mxu3 %v155_v47  ;;  %v121_v49 = vpop.permute.xlu1 %120 }
  0x8d   :  { %v146_v50 = vadd.f32 %v121_v49, %v90_v48  ;;  %v57_v51 = vpop.permute.xlu0 %56  ;;  %v245_v25 = vpop.permute.xlu2 %244 }
  0x8e   :  { %v89_v55 = vmul.f32 %v396_v26, %v57_v51 }
  0x8f   :  { %v154_v52 = vmax.f32 %v146_v50, 0.0 }
  0x91   :  { %212 = vmatpush.msra.mxu0 %v154_v52  ;;  %388 = vmatpush.msra.mxu3 %v154_v52 }
  0x94   :  { %v47_v60 = vpop.permute.xlu1 %46 }
  0x95   :  { %v116_v56 = vpop.permute.xlu0 %115  ;;  %v87_v62 = vmul.f32 %v396_v26, %v47_v60  ;;  %v291_v41 = vpop.permute.xlu2 %290 }
  0x96   :  { %v145_v58 = vadd.f32 %v116_v56, %v89_v55 }
  0x98   :  { %v153_v59 = vmax.f32 %v145_v58, 0.0 }
  0x9a   :  { %213 = vmatpush.msra.mxu0 %v153_v59  ;;  %389 = vmatpush.msra.mxu3 %v153_v59 }
  0x9c   :  { %214 = vmatpush.msra.mxu0 %v152_v61  ;;  %390 = vmatpush.msra.mxu3 %v152_v61  ;;  %v185_v8 = vpop.permute.xlu1 %184 }
  0x9d   :  { %v106_v63 = vpop.permute.xlu0 %105 }
  0x9e   :  { %v143_v0 = vadd.f32 %v106_v63, %v87_v62 }
  0xa0   :  { %v151_v1 = vmax.f32 %v143_v0, 0.0 }
  0xa2   :  { %215 = vmatpush.msra.mxu0 %v151_v1  ;;  %391 = vmatpush.msra.mxu3 %v151_v1 }
  0xa3   :  { %376 = vmatmul.msk.f32.vlgmr.msra.gmra.mxu0 %vm187_vm0, %v159_v2  ;;  %378 = vmatmul.msk.f32.vlgmr.msra.gmra.mxu3 %vm187_vm0, %v161_v3 }
  0xa4   :  { %v170_v17 = vpop.permute.xlu1 %169 }
  0xa5   :  { %v175_v14 = vpop.permute.xlu0 %174 }
  0xab   :  { %377 = vmatmul.msk.f32.gmra.mxu0 %vm187_vm0, %v160_v4  ;;  %379 = vmatmul.msk.f32.gmra.mxu3 %vm187_vm0, %v162_v5 }
  0xac   :  { %v286_v34 = vpop.permute.xlu1 %285 }
  0xad   :  { %v240_v26 = vpop.permute.xlu0 %239 }
 0x120   :  { %v217_v6 = vpop.f32.mrf.mxu0 }
 0x121   :  { %v218_v18 = vadd.f32 %v217_v6, %v170_v17 }
 0x123   :  { %v229_v21 = vmax.f32 %v218_v18, 0.0 }
 0x126   :  { %v223_v7 = vpop.f32.mrf.mxu3 }
 0x127   :  { %v224_v12 = vadd.f32 %v223_v7, %v180_v9 }
 0x128   :  { %v220_v10 = vpop.f32.mrf.mxu0 }
 0x129   :  { %v221_v15 = vadd.f32 %v220_v10, %v175_v14  ;;  %v231_v19 = vmax.f32 %v224_v12, 0.0 }
 0x12b   :  { %v230_v20 = vmax.f32 %v221_v15, 0.0 }
 0x12e   :  { %v226_v11 = vpop.f32.mrf.mxu3 }
 0x12f   :  { %v227_v13 = vadd.f32 %v226_v11, %v185_v8 }
 0x131   :  { %v232_v16 = vmax.f32 %v227_v13, 0.0 }
 0x133   :  { %266 = vmatpush.msra.mxu1 %v232_v16 }
 0x135   :  { %267 = vmatpush.msra.mxu1 %v231_v19 }
 0x137   :  { %268 = vmatpush.msra.mxu1 %v230_v20 }
 0x139   :  { %269 = vmatpush.msra.mxu1 %v229_v21 }
 0x13a   :  { %380 = vmatmul.msk.f32.vlgmr.msra.gmra.mxu1 %vm247_vm1, %v233_v22 }
 0x142   :  { %381 = vmatmul.msk.f32.gmra.mxu1 %vm247_vm1, %v234_v23 }
 0x1b7   :  { %v271_v24 = vpop.f32.mrf.mxu1 }
 0x1b8   :  { %v272_v28 = vadd.f32 %v271_v24, %v240_v26 }
 0x1bf   :  { %v274_v27 = vpop.f32.mrf.mxu1 }
 0x1c0   :  { %v275_v29 = vadd.f32 %v274_v27, %v245_v25 }
 0x1c2   :  { %397 = vtanh.f32 %v275_v29 }
 0x1c3   :  { %399 = vtanh.f32 %v272_v28 }
 0x1c8   :  { %v398_v30 = vpop.eup %397 }
 0x1c9   :  { %314 = vmatpush.msra.mxu2 %v398_v30  ;;  %v400_v32 = vpop.eup %399 }
 0x1cb   :  { %315 = vmatpush.msra.mxu2 %v400_v32 }
 0x1cc   :  { %382 = vmatmul.msk.f32.vlgmr.msra.gmra.mxu2 %vm293_vm2, %v279_v31 }
 0x1d4   :  { %383 = vmatmul.msk.f32.gmra.mxu2 %vm293_vm2, %v280_v33 }
 0x24f   :  { %v317_v35 = vpop.f32.mrf.mxu2 }
 0x250   :  { %v318_v36 = vadd.f32 %v317_v35, %v286_v34 }
 0x252   :  { %v324_v37 = vsel %vm323_vm3, %v318_v36, -inf  ;;  %357 = vst [vmem:[%s592_s10 - $0x3] sm:$0x38] %v318_v36  ;;  %v358_v38 = vmul.f32 1.442695, %v318_v36 }
 0x253   :  { %v325_v39 = vrot.slane %v324_v37, 4 }
 0x254   :  { %401 = vpow2.f32 %v358_v38 }
 0x255   :  { %v326_v40 = vmax.f32 %v324_v37, %v325_v39 }
 0x257   :  { %v327_v42 = vrot.slane %v326_v40, 2  ;;  %v320_v43 = vpop.f32.mrf.mxu2 }
 0x258   :  { %v321_v44 = vadd.f32 %v320_v43, %v291_v41 }
 0x259   :  { %v328_v45 = vmax.f32 %v326_v40, %v327_v42 }
 0x25a   :  { %v402_v46 = vpop.eup %401  ;;  %v360_v47 = vmul.f32 1.442695, %v321_v44 }
 0x25b   :  { %v329_v48 = vrot.slane %v328_v45, 1  ;;  %362 = vst [vmem:[%s593_s11 - $0x6] sm:$0xc0] %v402_v46 }
 0x25c   :  { %403 = vpow2.f32 %v360_v47 }
 0x25d   :  { %v330_v49 = vmax.f32 %v328_v45, %v329_v48 }
 0x25f   :  { %v331_v50 = vsub.f32 %v318_v36, %v330_v49 }
 0x261   :  { %v332_v51 = vmul.f32 1.442695, %v331_v50 }
 0x262   :  { %v404_v52 = vpop.eup %403 }
 0x263   :  { %405 = vpow2.f32 %v332_v51  ;;  %363 = vst [vmem:[%s593_s11 + $0x2] sm:$0x1] %v404_v52 }
 0x269   :  { %v406_v53 = vpop.eup %405 }
 0x26a   :  { %v334_v54 = vsel %vm323_vm3, %v406_v53, 0.0 }
 0x26b   :  { %v335_v55 = vrot.slane %v334_v54, 4 }
 0x26d   :  { %v336_v56 = vadd.f32 %v335_v55, %v334_v54 }
 0x26f   :  { %v337_v57 = vrot.slane %v336_v56, 2 }
 0x271   :  { %v338_v58 = vadd.f32 %v337_v57, %v336_v56 }
 0x273   :  { %v339_v59 = vrot.slane %v338_v58, 1 }
 0x275   :  { %v340_v60 = vadd.f32 %v339_v59, %v338_v58 }
 0x277   :  { %407 = vrcp.f32 %v340_v60  ;;  %v352_v0 = vand.u32 2147483648, %v340_v60  ;;  %v350_v2 = vand.u32 2147483647, %v340_v60  ;;  %vm346_vm5 = vweird.f32 %v340_v60 }
 0x279   :  { %v353_v4 = vor.u32 1.1754944e-38, %v352_v0  ;;  %vm351_vm7 = vcmp.eq.f32.partialorder %v350_v2, 8.507059e+37 }
 0x27d   :  { %v408_v61 = vpop.eup %407 }
 0x27e   :  { %v342_v62 = vmul.f32 %v408_v61, %v340_v60  ;;  %vm347_vm4 = vweird.f32 %v408_v61 }
 0x27f   :  { %vm348_vm6 = vmor %vm346_vm5, %vm347_vm4 }
 0x280   :  { %v343_v63 = vsub.f32 1.0, %v342_v62 }
 0x282   :  { %v344_v1 = vmul.f32 %v408_v61, %v343_v63 }
 0x284   :  { %v345_v3 = vadd.f32 %v408_v61, %v344_v1 }
 0x286   :  { %v349_v5 = vsel %vm348_vm6, %v408_v61, %v345_v3 }
 0x287   :  { %v354_v6 = vsel %vm351_vm7, %v353_v4, %v349_v5 }
 0x288   :  { %v355_v7 = vmul.f32 %v406_v53, %v354_v6 }
 0x28a   :  { %356 = vst [vmem:[%s594_s9] sm:$0x7] %v355_v7 }

</bundles_post_ra>
